<compile_context>
chip_gen: v6e
topology: v6e:2x2x1
jax: 0.10.0
libtpu: 0.0.40
codegen_flags: <defaults>
</compile_context>

<pallas_src>
import math

import jax
import jax.numpy as jnp
from jax import lax
from jax.experimental import pallas as pl
from jax.experimental.pallas import tpu as pltpu


def _round_up(x, m):
    return ((x + m - 1) // m) * m


def _make_bce_dice_kernel(tm, chunks_per_split, valid_rows, has_partial, unroll):
    """Build the kernel body for a fixed (static) tiling configuration."""
    lanes = 128
    n_sub = tm // 8

    def _accumulate(x_ref, t_ref, acc_ref, *, masked):
        c = pl.program_id(1) * chunks_per_split + pl.program_id(2)  # global chunk
        base = c * tm

        def step(j, carry):
            bce_c, int_c, sig_c, tgt_c = carry
            r0 = pl.multiple_of(j * 8, 8)
            x = x_ref[pl.ds(r0, 8), :].astype(jnp.float32)
            t = t_ref[pl.ds(r0, 8), :].astype(jnp.float32)
            if masked:
                rid = base + r0 + lax.broadcasted_iota(jnp.int32, (8, lanes), 0)
                valid = rid < valid_rows
                # masked-out rows contribute exactly 0 to every partial sum
                x = jnp.where(valid, x, -1e30)
                t = jnp.where(valid, t, 0.0)
            # sigmoid + stable-softplus from a single tanh (no divide):
            u = 0.5 * jnp.tanh(0.5 * x)
            s = u + 0.5                                # == sigmoid(x), exact
            softplus = -jnp.log(jnp.abs(u) + 0.5)      # == log1p(exp(-|x|))
            bce = jnp.maximum(x, 0.0) - x * t + softplus
            return (bce_c + bce, int_c + s * t, sig_c + s, tgt_c + t)

        zero = jnp.zeros((8, lanes), jnp.float32)
        bce_c, int_c, sig_c, tgt_c = lax.fori_loop(
            0, n_sub, step, (zero, zero, zero, zero), unroll=unroll)

        acc_ref[0:8, :] += bce_c
        acc_ref[8:16, :] += int_c
        acc_ref[16:24, :] += sig_c
        acc_ref[24:32, :] += tgt_c

    def kernel(x_ref, t_ref, acc_ref):
        k = pl.program_id(2)

        @pl.when(k == 0)
        def _():
            acc_ref[...] = jnp.zeros_like(acc_ref)

        if has_partial:
            c = pl.program_id(1) * chunks_per_split + k
            is_partial = (c + 1) * tm > valid_rows

            @pl.when(jnp.logical_not(is_partial))
            def _():
                _accumulate(x_ref, t_ref, acc_ref, masked=False)

            @pl.when(is_partial)
            def _():
                _accumulate(x_ref, t_ref, acc_ref, masked=True)
        else:
            _accumulate(x_ref, t_ref, acc_ref, masked=False)

    return kernel


def bce_dice_loss(logits, target, *, block_rows=8192):
    """logits/target: (N, ...) float arrays. Returns scalar f32 loss."""
    lanes = 128
    n = logits.shape[0]
    d = math.prod(logits.shape[1:])
    x = logits.reshape(n, d)
    t = target.reshape(n, d)

    # Row alignment of the block: (8,128) tiles for 4-byte dtypes, 16 for bf16.
    itemsize = min(jnp.dtype(x.dtype).itemsize, jnp.dtype(t.dtype).itemsize)
    row_align = max(8, 32 // max(int(itemsize), 1))

    rows = pl.cdiv(d, lanes)

    # Adaptive chunk height: decide the number of reduction chunks first, then
    # the smallest aligned tile height that covers them, so padding / masking
    # is at most a few rows per chunk.
    target_chunks = max(1, pl.cdiv(rows, block_rows))
    if target_chunks > 1:
        target_chunks = _round_up(target_chunks, 2)   # let 2 TCs split evenly
    tm = max(row_align, _round_up(pl.cdiv(rows, target_chunks), row_align))

    # Fast path: flattened sample already lane/row aligned -> stream it with
    # ZERO wrapper-side copies; the row remainder of the last chunk is masked
    # in-kernel. Otherwise pad (only for lane-unaligned / tiny shapes);
    # padded logits=-1e9, targets=0 contribute exactly 0 to every sum.
    if d == rows * lanes and rows % row_align == 0:
        R = rows
    else:
        R = tm * pl.cdiv(rows, tm)
        pad = R * lanes - d
        x = jnp.pad(x, ((0, 0), (0, pad)), constant_values=-1e9)
        t = jnp.pad(t, ((0, 0), (0, pad)), constant_values=0.0)

    x = x.reshape(n, R, lanes)
    t = t.reshape(n, R, lanes)

    total_chunks = pl.cdiv(R, tm)
    has_partial = (R % tm) != 0                      # only in the no-pad path
    splits = 2 if (total_chunks >= 2 and total_chunks % 2 == 0) else 1
    cps = total_chunks // splits
    unroll = min(8, max(1, tm // 8))

    kernel = _make_bce_dice_kernel(tm, cps, R, has_partial, unroll)

    in_spec = pl.BlockSpec((None, tm, lanes), lambda i, s, k: (i, s * cps + k, 0))
    out_spec = pl.BlockSpec((None, None, 32, lanes), lambda i, s, k: (i, s, 0, 0))

    acc = pl.pallas_call(
        kernel,
        out_shape=jax.ShapeDtypeStruct((n, splits, 32, lanes), jnp.float32),
        grid_spec=pltpu.PrefetchScalarGridSpec(
            num_scalar_prefetch=0,
            grid=(n, splits, cps),
            in_specs=[in_spec, in_spec],
            out_specs=out_spec,
        ),
        compiler_params=pltpu.CompilerParams(
            dimension_semantics=("parallel", "parallel", "arbitrary"),
            vmem_limit_bytes=32 * 1024 * 1024,
        ),
    )(x, t)

    # Tiny scalar epilogue (glue) in plain JAX.
    smooth = 1e-05
    acc = acc.sum(axis=1)                            # (n, 32, 128)
    bce = acc[:, 0:8, :].sum() / jnp.float32(n * d)
    inter = acc[:, 8:16, :].sum(axis=(1, 2))
    isum = acc[:, 16:24, :].sum(axis=(1, 2))
    tsum = acc[:, 24:32, :].sum(axis=(1, 2))
    dice = (2.0 * inter + smooth) / (isum + tsum + smooth)
    dice_loss = 1.0 - jnp.sum(dice) / jnp.float32(n)
    return 0.5 * bce + dice_loss


def _reference(logits, target):
    x = logits.astype(jnp.float32)
    t = target.astype(jnp.float32)
    bce = jnp.mean(jnp.maximum(x, 0.0) - x * t + jnp.log1p(jnp.exp(-jnp.abs(x))))
    n = x.shape[0]
    xi = jax.nn.sigmoid(x).reshape(n, -1)
    ti = t.reshape(n, -1)
    smooth = 1e-05
    inter = jnp.sum(xi * ti, axis=1)
    dice = (2.0 * inter + smooth) / (jnp.sum(xi, axis=1) + jnp.sum(ti, axis=1) + smooth)
    return 0.5 * bce + (1.0 - jnp.sum(dice) / n)


if __name__ == "__main__":
    key = jax.random.PRNGKey(0)
    k1, k2 = jax.random.split(key)
    N, C, H, W = 2, 4, 16, 16
    logits = jax.random.normal(k1, (N, C, H, W), dtype=jnp.float32)
    # targets are soft labels in [0, 1], as BCE-with-logits allows
    target = jax.random.uniform(k2, (N, C, H, W), dtype=jnp.float32)

    loss = bce_dice_loss(logits, target)
    loss = jax.block_until_ready(loss)

    ref = jax.block_until_ready(_reference(logits, target))
    assert jnp.allclose(loss, ref, rtol=1e-5, atol=1e-5), (loss, ref)

    print("KERNEL_OK")
</pallas_src>

<mosaic_0001>
module attributes {stable_mosaic.version = 11 : i64} {
  func.func @kernel(%arg0: i32, %arg1: i32, %arg2: i32, %arg3: memref<1x8x128xf32, #tpu.memory_space<vmem>>, %arg4: memref<1x8x128xf32, #tpu.memory_space<vmem>>, %arg5: memref<1x1x32x128xf32, #tpu.memory_space<vmem>>) attributes {dimension_semantics = [#tpu.dimension_semantics<parallel>, #tpu.dimension_semantics<parallel>, #tpu.dimension_semantics<arbitrary>], iteration_bounds = array<i64: 2, 1, 1>, scalar_prefetch = 0 : i64, scratch_operands = 0 : i64, tpu.core_type = #tpu.core_type<tc>, window_params = [{transform_indices = @transform_0, window_bounds = array<i64: 1, 8, 128>}, {transform_indices = @transform_1, window_bounds = array<i64: 1, 8, 128>}, {transform_indices = @transform_2, window_bounds = array<i64: 1, 1, 32, 128>}]} {
    %c0_i32 = arith.constant 0 : i32
    %0 = arith.cmpi eq, %arg2, %c0_i32 : i32
    %1 = arith.extui %0 : i1 to i32
    %c0_i32_0 = arith.constant 0 : i32
    %2 = arith.cmpi ne, %1, %c0_i32_0 : i32
    scf.if %2 {
      %cst_40 = arith.constant 0.000000e+00 : f32
      %59 = vector.broadcast %cst_40 : f32 to vector<32x128xf32>
      %c0_41 = arith.constant 0 : index
      %c0_42 = arith.constant 0 : index
      %c0_43 = arith.constant 0 : index
      %c0_44 = arith.constant 0 : index
      %60 = vector.load %arg5[%c0_41, %c0_42, %c0_43, %c0_44] : memref<1x1x32x128xf32, #tpu.memory_space<vmem>>, vector<1x1x32x128xf32>
      %61 = vector.shape_cast %60 : vector<1x1x32x128xf32> to vector<32x128xf32>
      %62 = vector.shape_cast %59 : vector<32x128xf32> to vector<1x1x32x128xf32>
      tpu.vector_store %arg5[%c0_41, %c0_42, %c0_43, %c0_44], %62 {strides = array<i32>} : memref<1x1x32x128xf32, #tpu.memory_space<vmem>>, vector<1x1x32x128xf32>,
    } else {
    }
    %cst = arith.constant 0.000000e+00 : f32
    %3 = vector.broadcast %cst : f32 to vector<8x128xf32>
    %c0_i32_1 = arith.constant 0 : i32
    %c8_i32 = arith.constant 8 : i32
    %4 = arith.muli %c0_i32_1, %c8_i32 : i32
    %5 = tpu.assume_multiple %4, 8 : i32
    %c0 = arith.constant 0 : index
    %6 = arith.index_cast %5 : i32 to index
    %c0_2 = arith.constant 0 : index
    %7 = vector.load %arg3[%c0, %6, %c0_2] : memref<1x8x128xf32, #tpu.memory_space<vmem>>, vector<1x8x128xf32>
    %8 = vector.shape_cast %7 : vector<1x8x128xf32> to vector<8x128xf32>
    %c0_3 = arith.constant 0 : index
    %9 = arith.index_cast %5 : i32 to index
    %c0_4 = arith.constant 0 : index
    %10 = vector.load %arg4[%c0_3, %9, %c0_4] : memref<1x8x128xf32, #tpu.memory_space<vmem>>, vector<1x8x128xf32>
    %11 = vector.shape_cast %10 : vector<1x8x128xf32> to vector<8x128xf32>
    %cst_5 = arith.constant 5.000000e-01 : f32
    %12 = vector.broadcast %cst_5 : f32 to vector<8x128xf32>
    %13 = arith.mulf %12, %8 : vector<8x128xf32>
    %14 = math.tanh %13 : vector<8x128xf32>
    %cst_6 = arith.constant 5.000000e-01 : f32
    %15 = vector.broadcast %cst_6 : f32 to vector<8x128xf32>
    %16 = arith.mulf %15, %14 : vector<8x128xf32>
    %cst_7 = arith.constant 5.000000e-01 : f32
    %17 = vector.broadcast %cst_7 : f32 to vector<8x128xf32>
    %18 = arith.addf %16, %17 : vector<8x128xf32>
    %19 = math.absf %16 : vector<8x128xf32>
    %cst_8 = arith.constant 5.000000e-01 : f32
    %20 = vector.broadcast %cst_8 : f32 to vector<8x128xf32>
    %21 = arith.addf %19, %20 : vector<8x128xf32>
    %22 = math.log %21 : vector<8x128xf32>
    %cst_9 = arith.constant 0.000000e+00 : f32
    %23 = vector.broadcast %cst_9 : f32 to vector<8x128xf32>
    %24 = arith.subf %23, %22 : vector<8x128xf32>
    %cst_10 = arith.constant 0.000000e+00 : f32
    %25 = vector.broadcast %cst_10 : f32 to vector<8x128xf32>
    %26 = arith.maximumf %8, %25 : vector<8x128xf32>
    %27 = arith.mulf %8, %11 : vector<8x128xf32>
    %28 = arith.subf %26, %27 : vector<8x128xf32>
    %29 = arith.addf %28, %24 : vector<8x128xf32>
    %30 = arith.addf %3, %29 : vector<8x128xf32>
    %31 = arith.mulf %18, %11 : vector<8x128xf32>
    %32 = arith.addf %3, %31 : vector<8x128xf32>
    %33 = arith.addf %3, %18 : vector<8x128xf32>
    %34 = arith.addf %3, %11 : vector<8x128xf32>
    %c1_i32 = arith.constant 1 : i32
    %c0_11 = arith.constant 0 : index
    %c0_12 = arith.constant 0 : index
    %c0_13 = arith.constant 0 : index
    %c0_14 = arith.constant 0 : index
    %35 = vector.load %arg5[%c0_11, %c0_12, %c0_13, %c0_14] : memref<1x1x32x128xf32, #tpu.memory_space<vmem>>, vector<1x1x8x128xf32>
    %36 = vector.shape_cast %35 : vector<1x1x8x128xf32> to vector<8x128xf32>
    %37 = arith.addf %36, %30 : vector<8x128xf32>
    %c0_15 = arith.constant 0 : index
    %c0_16 = arith.constant 0 : index
    %c0_17 = arith.constant 0 : index
    %c0_18 = arith.constant 0 : index
    %38 = vector.load %arg5[%c0_15, %c0_16, %c0_17, %c0_18] : memref<1x1x32x128xf32, #tpu.memory_space<vmem>>, vector<1x1x8x128xf32>
    %39 = vector.shape_cast %38 : vector<1x1x8x128xf32> to vector<8x128xf32>
    %40 = vector.shape_cast %37 : vector<8x128xf32> to vector<1x1x8x128xf32>
    tpu.vector_store %arg5[%c0_15, %c0_16, %c0_17, %c0_18], %40 {strides = array<i32>} : memref<1x1x32x128xf32, #tpu.memory_space<vmem>>, vector<1x1x8x128xf32>,
    %c0_19 = arith.constant 0 : index
    %c0_20 = arith.constant 0 : index
    %c8 = arith.constant 8 : index
    %c0_21 = arith.constant 0 : index
    %41 = vector.load %arg5[%c0_19, %c0_20, %c8, %c0_21] : memref<1x1x32x128xf32, #tpu.memory_space<vmem>>, vector<1x1x8x128xf32>
    %42 = vector.shape_cast %41 : vector<1x1x8x128xf32> to vector<8x128xf32>
    %43 = arith.addf %42, %32 : vector<8x128xf32>
    %c0_22 = arith.constant 0 : index
    %c0_23 = arith.constant 0 : index
    %c8_24 = arith.constant 8 : index
    %c0_25 = arith.constant 0 : index
    %44 = vector.load %arg5[%c0_22, %c0_23, %c8_24, %c0_25] : memref<1x1x32x128xf32, #tpu.memory_space<vmem>>, vector<1x1x8x128xf32>
    %45 = vector.shape_cast %44 : vector<1x1x8x128xf32> to vector<8x128xf32>
    %46 = vector.shape_cast %43 : vector<8x128xf32> to vector<1x1x8x128xf32>
    tpu.vector_store %arg5[%c0_22, %c0_23, %c8_24, %c0_25], %46 {strides = array<i32>} : memref<1x1x32x128xf32, #tpu.memory_space<vmem>>, vector<1x1x8x128xf32>,
    %c0_26 = arith.constant 0 : index
    %c0_27 = arith.constant 0 : index
    %c16 = arith.constant 16 : index
    %c0_28 = arith.constant 0 : index
    %47 = vector.load %arg5[%c0_26, %c0_27, %c16, %c0_28] : memref<1x1x32x128xf32, #tpu.memory_space<vmem>>, vector<1x1x8x128xf32>
    %48 = vector.shape_cast %47 : vector<1x1x8x128xf32> to vector<8x128xf32>
    %49 = arith.addf %48, %33 : vector<8x128xf32>
    %c0_29 = arith.constant 0 : index
    %c0_30 = arith.constant 0 : index
    %c16_31 = arith.constant 16 : index
    %c0_32 = arith.constant 0 : index
    %50 = vector.load %arg5[%c0_29, %c0_30, %c16_31, %c0_32] : memref<1x1x32x128xf32, #tpu.memory_space<vmem>>, vector<1x1x8x128xf32>
    %51 = vector.shape_cast %50 : vector<1x1x8x128xf32> to vector<8x128xf32>
    %52 = vector.shape_cast %49 : vector<8x128xf32> to vector<1x1x8x128xf32>
    tpu.vector_store %arg5[%c0_29, %c0_30, %c16_31, %c0_32], %52 {strides = array<i32>} : memref<1x1x32x128xf32, #tpu.memory_space<vmem>>, vector<1x1x8x128xf32>,
    %c0_33 = arith.constant 0 : index
    %c0_34 = arith.constant 0 : index
    %c24 = arith.constant 24 : index
    %c0_35 = arith.constant 0 : index
    %53 = vector.load %arg5[%c0_33, %c0_34, %c24, %c0_35] : memref<1x1x32x128xf32, #tpu.memory_space<vmem>>, vector<1x1x8x128xf32>
    %54 = vector.shape_cast %53 : vector<1x1x8x128xf32> to vector<8x128xf32>
    %55 = arith.addf %54, %34 : vector<8x128xf32>
    %c0_36 = arith.constant 0 : index
    %c0_37 = arith.constant 0 : index
    %c24_38 = arith.constant 24 : index
    %c0_39 = arith.constant 0 : index
    %56 = vector.load %arg5[%c0_36, %c0_37, %c24_38, %c0_39] : memref<1x1x32x128xf32, #tpu.memory_space<vmem>>, vector<1x1x8x128xf32>
    %57 = vector.shape_cast %56 : vector<1x1x8x128xf32> to vector<8x128xf32>
    %58 = vector.shape_cast %55 : vector<8x128xf32> to vector<1x1x8x128xf32>
    tpu.vector_store %arg5[%c0_36, %c0_37, %c24_38, %c0_39], %58 {strides = array<i32>} : memref<1x1x32x128xf32, #tpu.memory_space<vmem>>, vector<1x1x8x128xf32>,
    return
  }
  func.func @transform_0(%arg0: i32, %arg1: i32, %arg2: i32) -> (i32, i32, i32) {
    %c1_i32 = arith.constant 1 : i32
    %0 = arith.muli %arg1, %c1_i32 : i32
    %1 = arith.addi %0, %arg2 : i32
    %c0_i32 = arith.constant 0 : i32
    %c0_i32_0 = arith.constant 0 : i32
    return %arg0, %1, %c0_i32 : i32, i32, i32
  }
  func.func @transform_1(%arg0: i32, %arg1: i32, %arg2: i32) -> (i32, i32, i32) {
    %c1_i32 = arith.constant 1 : i32
    %0 = arith.muli %arg1, %c1_i32 : i32
    %1 = arith.addi %0, %arg2 : i32
    %c0_i32 = arith.constant 0 : i32
    %c0_i32_0 = arith.constant 0 : i32
    return %arg0, %1, %c0_i32 : i32, i32, i32
  }
  func.func @transform_2(%arg0: i32, %arg1: i32, %arg2: i32) -> (i32, i32, i32, i32) {
    %c0_i32 = arith.constant 0 : i32
    %c0_i32_0 = arith.constant 0 : i32
    %c0_i32_1 = arith.constant 0 : i32
    return %arg0, %arg1, %c0_i32, %c0_i32_0 : i32, i32, i32, i32
  }
}

</mosaic_0001>

<bundles_post_ra>
// kernel: tpu_custom_call.1
= control target key start
LH: loop header
LB: loop body
LE: loop exit
PB: predicated region body
PF: predicated region fallthrough
CT: control target
= control target key end

     0   :  { %7 = vsyncpa [#allocation3], 0  ;;  %s831_s0 = inlined_call_operand.hbm [shape: f32[2,8,128], index: 0, kind: input, shape index: {}]   ;;  %s832_s1 = inlined_call_operand.hbm [shape: f32[2,8,128], index: 1, kind: input, shape index: {}]   ;;  %s833_s2 = inlined_call_operand.hbm [shape: f32[2,1,32,128], index: 2, kind: output, shape index: {}]  }
   0x1   :  { %9 = vsyncpa [#allocation3 + $0x1], 0 }
   0x2   :  { %10 = vsyncpa [#allocation6], 0 }
   0x3   :  { %12 = vsyncpa [#allocation6 + $0x1], 0 }
   0x4   :  { %13 = vsyncpa [#allocation4], 0 }
   0x5   :  { %15 = vsyncpa [#allocation4 + $0x1], 0  ;;  %s655_s9 = smov 0   ;;  %s657_s10 = smov 0  }
   0x6   :  { %s659_s11 = smov 0   ;;  %s661_s12 = smov 0  }
   0x7   :  { %s663_s13 = smov 0   ;;  %s665_s14 = smov 0  }
   0x8 LB: > { %s401_s15 = sadd.s32 4294967295, %s633_s14   ;;  %s402_s16 = sadd.s32 4294967294, %s633_s14   ;;  %s633_s14 = sphi %s665_s14, %s21_s14   ;;  %s629_s13 = sphi %s663_s13, %s845_s13   ;;  %s625_s12 = sphi %s661_s12, %s844_s12   ;;  %s621_s11 = sphi %s659_s11, %s843_s11   ;;  %s617_s10 = sphi %s657_s10, %s842_s10   ;;  %s613_s9 = sphi %s655_s9, %s841_s9  }
   0x9   : > { %s40_s17 = sadd.s32 1, %s629_s13  ;;  %s51_s18 = sadd.s32 1, %s621_s11 }
   0xa   : > { %p42_p0 = scmp.ge.s32.totalorder %s40_s17, 2  ;;  %p58_p1 = scmp.ne.s32.totalorder %s621_s11, %s617_s10 }
   0xb   : > { %p59_p2 = scmp.eq.s32.totalorder %s633_s14, 0  ;;  %p64_p3 = scmp.ne.s32.totalorder %s617_s10, %s613_s9 }
   0xc   : > { %s847_s17 = smov (%p42_p0, %s40_s17), 0  ;;  %p65_p5 = scmp.eq.s32.totalorder %s401_s15, 0 }
   0xd   : > { %p696_p4 = por %p59_p2, %p58_p1  ;;  %s46_s20 = ssub.s32 %s629_s13, %s847_s17 }
   0xe   : > { %p120_p6 = scmp.eq.s32.totalorder %s401_s15, 1  ;;  %p49_p7 = scmp.eq.s32.totalorder %s46_s20, 0 }
   0xf   : > { %p702_p8 = por %p65_p5, %p64_p3  ;;  %p126_p10 = scmp.eq.s32.totalorder %s402_s16, 1 }
  0x10   : > { %p706_p9 = por %p120_p6, %p58_p1  ;;  %p436_p13 = scmp.lt.s32.totalorder %s633_s14, 2 }
  0x11   : > { %s711_s23 = scalar_select %p49_p7, %s621_s11, %s51_s18  }
  0x12   : > { %p713_p11 = por %p126_p10, %p64_p3  ;;  %s720_s25 = sand.u32 1, %s621_s11  }
  0x13   : > { %s405_s26 = sshll.u32 %s720_s25, 3  ;;  %s406_s27 = sshll.u32 %s629_s13, 7 }
  0x14   : > { %s157_s30 = scalar_lea.hbm %s831_s0, %s406_s27  ;;  %s150_s3 = scalar_lea.vmem [#allocation2], %s405_s26 }
  0x15   : > { %s159_s4 = sshll.u32 %s150_s3, 4  ;;  %p729_p0 = pnand %p436_p13, %p696_p4  ;;  %s160_s4 = int_to_ptr.vmem [resolvable:$true] %s159_s4 }
  0x16   : > { %p409_p1 = scmp.ge.s32.totalorder %s633_s14, 1  ;;  %p184_p2 = scmp.lt.s32.totalorder %s633_s14, 3 }
  0x17   : > { %s147_s6 = scalar_lea.sflag [#allocation3], %s720_s25  ;;  %p495_p3 = pneg %p729_p0 }
  0x18   : > { %s506_s7 = scalar_lea.vmem %s160_s4, 128  ;;  %s635_s8 = smov [#allocation2]  }
  0x19   : > { %p507_p5 = scmp.ne.s32.totalorder %s160_s4, %s506_s7  ;;  %s511_s15 = sshll.u32 %s635_s8, 4  ;;  %s512_s15 = int_to_ptr.vmem [resolvable:$false] %s511_s15 }
  0x1a   : > { %s513_s16 = scalar_lea.vmem %s512_s15, 256  ;;  %p514_p4 = scmp.lt.s32.totalorder %s160_s4, %s512_s15 }
  0x1b   : > { %p509_p6 = pnand %p507_p5, %p495_p3  ;;  %p515_p10 = scmp.lt.s32.totalorder %s513_s16, %s506_s7 }
  0x1d   : > { %p510_p7 = pneg %p509_p6  ;;  %p516_p13 = por %p515_p10, %p514_p4 }
  0x1f   : > { %p517_p12 = pnand %p516_p13, %p510_p7 }
  0x21   : > { %520 = shalt.err (!%p517_p12)
}
  0x22   : > { %428 = dma.hbm_to_vmem [thread:$0]  (!%p729_p0), %s157_s30, 128, %s160_s4, %s147_s6  }
  0x23   : > { %p747_p5 = pnand %p409_p1, %p184_p2  ;;  %s177_s28 = scalar_lea.hbm %s832_s1, %s406_s27 }
  0x24   : > { %s170_s29 = scalar_lea.vmem [#allocation5], %s405_s26  ;;  %s167_s7 = scalar_lea.sflag [#allocation6], %s720_s25 }
  0x25   : > { %s179_s3 = sshll.u32 %s170_s29, 4  ;;  %s636_s30 = smov [#allocation5]   ;;  %s180_s3 = int_to_ptr.vmem [resolvable:$true] %s179_s3 }
  0x26   : > { %s534_s8 = scalar_lea.vmem %s180_s3, 128  ;;  %s539_s4 = sshll.u32 %s636_s30, 4  ;;  %s540_s4 = int_to_ptr.vmem [resolvable:$false] %s539_s4 }
  0x27   : > { %p535_p12 = scmp.ne.s32.totalorder %s180_s3, %s534_s8  ;;  %s541_s6 = scalar_lea.vmem %s540_s4, 256 }
  0x28   : > { %p542_p1 = scmp.lt.s32.totalorder %s180_s3, %s540_s4  ;;  %p543_p2 = scmp.lt.s32.totalorder %s541_s6, %s534_s8 }
  0x29   : > { %p537_p6 = pnand %p535_p12, %p495_p3 }
  0x2a   : > { %p544_p4 = por %p543_p2, %p542_p1 }
  0x2b   : > { %p538_p7 = pneg %p537_p6 }
  0x2d   : > { %p545_p10 = pnand %p544_p4, %p538_p7 }
  0x2f   : > { %548 = shalt.err (!%p545_p10)
}
  0x30   : > { %431 = dma.hbm_to_vmem [thread:$0]  (!%p729_p0), %s177_s28, 128, %s180_s3, %s167_s7  }
  0x31   : > { %188 = sbr.rel (%p747_p5) target bundleno = 114 (0x72), region = 28  ;;  %s763_s25 = sand.u32 (!%p747_p5), 1, %s617_s10  }
  0x32   : > { %s410_s26 = sshll.u32 (!%p747_p5), %s763_s25, 3  ;;  %s191_s27 = scalar_lea.sflag (!%p747_p5), [#allocation3], %s763_s25 }
  0x33   : > { %s194_s15 = scalar_lea.vmem (!%p747_p5), [#allocation2], %s410_s26 }
  0x36   : > { %600 = dma.done.wait (%p702_p8), %s191_s27, 128  }
  0x37   : > { %602 = vsyncadd (%p702_p8), %s191_s27, 4294967168  ;;  %s200_s5 = scalar_lea.sflag [#allocation6], %s763_s25  ;;  %s203_s16 = scalar_lea.vmem [#allocation5], %s410_s26 }
  0x38   : > { %604 = dma.done.wait (%p702_p8), %s200_s5, 128  }
  0x39   : > { %606 = vsyncadd (%p702_p8), %s200_s5, 4294967168  ;;  %s412_s18 = sshll.u32 %s763_s25, 5  ;;  %v239_v0 = vld [vmem:[%s194_s15] sm:$0xff]  ;;  %v240_v1 = vld [vmem:[%s203_s16] sm:$0xff]  ;;  %s418_s21 = sshll.u32 %s625_s12, 9 }
  0x3a   : > { %v241_v2 = vmul.f32 0.5, %v239_v0  ;;  %s228_s19 = scalar_lea.vmem [#allocation7], %s412_s18  ;;  %v250_v9 = vmax.f32 %v239_v0, 0.0  ;;  %v251_v10 = vmul.f32 %v240_v1, %v239_v0  ;;  %s781_s3 = scalar_lea.hbm %s833_s2, %s418_s21 }
  0x3b   : > { %270 = vst [vmem:[%s228_s19 + $0x18] sm:$0xff] %v240_v1  ;;  %s287_s20 = sshll.u32 %s228_s19, 4  ;;  %s272_s7 = scalar_lea.sflag [#allocation4], %s763_s25  ;;  %s783_s20 = int_to_ptr.vmem [resolvable:$true] %s287_s20 }
  0x3c   : > { %489 = vtanh.f32 %v241_v2  ;;  %v252_v13 = vsub.f32 %v250_v9, %v251_v10  ;;  %s549_s8 = scalar_lea.vmem %s783_s20, 512  ;;  %s637_s12 = smov [#allocation7]  }
  0x3d   : > { %p550_p8 = scmp.ne.s32.totalorder %s783_s20, %s549_s8  ;;  %s553_s30 = sshll.u32 %s637_s12, 4  ;;  %s554_s30 = int_to_ptr.vmem [resolvable:$false] %s553_s30 }
  0x3e   : > { %s555_s4 = scalar_lea.vmem %s554_s30, 1024  ;;  %p556_p13 = scmp.lt.s32.totalorder %s783_s20, %s554_s30 }
  0x3f   : > { %p551_p0 = pnand %p550_p8, %p706_p9  ;;  %p557_p5 = scmp.lt.s32.totalorder %s555_s4, %s549_s8 }
  0x41   : > { %p552_p3 = pneg %p551_p0  ;;  %p558_p12 = por %p557_p5, %p556_p13 }
  0x43   : > { %p559_p6 = pnand %p558_p12, %p552_p3 }
  0x49   : > { %v490_v3 = vpop.eup %489 }
  0x4a   : > { %v243_v4 = vmul.f32 0.5, %v490_v3 }
  0x4c   : > { %v245_v5 = vand.u32 2147483647, %v243_v4  ;;  %v244_v6 = vadd.f32 0.5, %v243_v4 }
  0x4e   : > { %v246_v7 = vadd.f32 0.5, %v245_v5  ;;  %v255_v8 = vmul.f32 %v244_v6, %v240_v1  ;;  %267 = vst [vmem:[%s228_s19 + $0x10] sm:$0xff] %v244_v6 }
  0x50   : > { %491 = vlog2.f32 %v246_v7  ;;  %264 = vst [vmem:[%s228_s19 + $0x8] sm:$0xff] %v255_v8 }
  0x5d   : > { %v492_v11 = vpop.eup %491 }
  0x5e   : > { %v248_v12 = vmul.f32 0.6931472, %v492_v11 }
  0x60   : > { %v249_v14 = vsub.f32 0.0, %v248_v12 }
  0x62   : > { %v253_v15 = vadd.f32 %v252_v13, %v249_v14 }
  0x64   : > { %261 = vst [vmem:[%s228_s19] sm:$0xff] %v253_v15 }
  0x65   : > { %562 = shalt.err (!%p559_p6)
}
  0x66   : > { %s563_s6 = scalar_lea.hbm %s781_s3, 512  ;;  %s567_s15 = scalar_lea.hbm %s833_s2, 1024 }
  0x67   : > { %p564_p7 = scmp.ne.s32.totalorder %s781_s3, %s563_s6  ;;  %p568_p4 = scmp.lt.s32.totalorder %s781_s3, %s833_s2 }
  0x68   : > { %p569_p10 = scmp.lt.s32.totalorder %s567_s15, %s563_s6 }
  0x69   : > { %p565_p1 = pnand %p564_p7, %p706_p9 }
  0x6a   : > { %p570_p8 = por %p569_p10, %p568_p4 }
  0x6b   : > { %p566_p2 = pneg %p565_p1 }
  0x6d   : > { %p571_p0 = pnand %p570_p8, %p566_p2 }
  0x6f   : > { %574 = shalt.err (!%p571_p0)
}
  0x70   : > { %s638_s18 = smov 128   ;;  %s639_s19 = smov 8  }
  0x71   : > { %423 = dma.vmem_to_hbm [thread:$0]  (%p706_p9), %s783_s20, 512, %s781_s3, %s272_s7, %s638_s18, %s638_s18, %s639_s19  }
  0x72 PF: > { %s302_s21 = sand.u32 1, %s613_s9   ;;  %p840_p3 = scmp.ge.s32.totalorder %s633_s14, 2 }
  0x73   : > { %s303_s28 = scalar_lea.sflag [#allocation4], %s302_s21 }
  0x74   : > { %p433_p13 = pnand %p840_p3, %p713_p11 }
  0x76   : > { %p434_p5 = pneg %p433_p13 }
  0x78   : > { %608 = dma.done.wait (%p434_p5), %s303_s28, 512  }
  0x79   : > { %610 = vsyncadd (%p434_p5), %s303_s28, 4294966784  ;;  %s21_s14 = sadd.s32 1, %s633_s14   ;;  %s841_s9 = smov %s617_s10 }
  0x7a   : > { %p18_p12 = scmp.ge.s32.totalorder %s21_s14, 4   ;;  %s842_s10 = smov %s621_s11 }
  0x7b   : > { %s843_s11 = smov %s711_s23  ;;  %s844_s12 = smov %s629_s13 }
  0x7c   : > { %s845_s13 = smov %s847_s17  ;;  %20 = sbr.rel (!%p18_p12) target bundleno = 8 (0x8), region = 90 }
  0x81   :  { %308 = vsyncpa [#allocation3], 1 }
  0x82   :  { %310 = vsyncpa [#allocation3 + $0x1], 1 }
  0x83   :  { %311 = vsyncpa [#allocation6], 1 }
  0x84   :  { %313 = vsyncpa [#allocation6 + $0x1], 1 }
  0x85   :  { %314 = vsyncpa [#allocation4], 1 }
  0x86   :  { %316 = vsyncpa [#allocation4 + $0x1], 1 }

</bundles_post_ra>
